<compile_context>
chip_gen: v5e
topology: v5e:2x2
jax: 0.10.0
libtpu: 0.0.40
codegen_flags: <defaults>
</compile_context>

<pallas_src>
import numpy as np
import jax
import jax.numpy as jnp
from jax.experimental import pallas as pl
from jax.experimental.pallas import tpu as pltpu


# ----------------------------------------------------------------------------
# Fused forward kernel factory
# ----------------------------------------------------------------------------
def make_forward(bs, N, F, H, L, n_cmt, hidden_fc, n_classes):
    BN = bs * N
    f32 = jnp.float32

    def kernel(x_ref, abd_ref, w0_ref, b0_ref, wrest_ref, brest_ref, fcw_ref,
               fcb_ref, poolT_ref, bsel_ref, w1_ref, b1_ref, w2_ref, b2_ref,
               out_ref):
        abd = abd_ref[...]                      # (bs*N, bs*N) block-diag Ahat
        x = x_ref[...]                          # (bs*N, F)

        # ---- layer 0: GCNConv(F -> H) -----------------------------------
        # (A @ X) @ W is cheaper than A @ (X @ W) when F < H.
        if F < H:
            ax = jnp.dot(abd, x, preferred_element_type=f32)
            h = jnp.dot(ax, w0_ref[...], preferred_element_type=f32)
        else:
            h = jnp.dot(abd, jnp.dot(x, w0_ref[...], preferred_element_type=f32),
                        preferred_element_type=f32)
        h = jnp.maximum(h + b0_ref[...], 0.0)   # (bs*N, H)

        # running per-node fc projection:  sum_l  h_l @ fc_w_block_l
        nodefc = jnp.dot(h, fcw_ref[0], preferred_element_type=f32)   # (bs*N, 1)

        # ---- layers 1..L-1: GCNConv(H -> H), statically unrolled ---------
        for l in range(1, L):
            hw = jnp.dot(h, wrest_ref[l - 1], preferred_element_type=f32)
            agg = jnp.dot(abd, hw, preferred_element_type=f32)
            h = jnp.maximum(agg + brest_ref[l - 1], 0.0)
            nodefc = nodefc + jnp.dot(h, fcw_ref[l], preferred_element_type=f32)

        # ---- pathway scatter_mean pooling + fc ---------------------------
        # emb[b, c] = sum_n Pnorm[c, n] * nodefc[b*N + n] + fc_b
        pooled = poolT_ref[...] * nodefc                               # (bs*N, n_cmt)
        emb = jnp.dot(bsel_ref[...], pooled, preferred_element_type=f32) \
            + fcb_ref[...]                                             # (bs, n_cmt)

        # ---- lin1 + ReLU (dropout = identity in eval) --------------------
        h1 = jnp.maximum(
            jnp.dot(emb, w1_ref[...], preferred_element_type=f32) + b1_ref[...],
            0.0)                                                       # (bs, hidden_fc)

        # ---- lin2 + log_softmax ------------------------------------------
        z = jnp.dot(h1, w2_ref[...], preferred_element_type=f32) + b2_ref[...]
        m = jnp.max(z, axis=-1, keepdims=True)
        zs = z - m
        out_ref[...] = zs - jnp.log(jnp.sum(jnp.exp(zs), axis=-1, keepdims=True))

    def full_spec(shape):
        nd = len(shape)
        return pl.BlockSpec(shape, lambda i, nd=nd: (0,) * nd)

    def forward(x, params, consts):
        abd, poolT, bsel = consts
        x2 = x.reshape(BN, F)                                   # batch-major rows: b*N + n
        fcb = jnp.tile(params["fc_b"].reshape(1, 1), (1, n_cmt))
        ins = [
            x2, abd,
            params["w0"], params["b0"].reshape(1, H),
            params["wrest"], params["brest"],
            params["fcw_blocks"], fcb,
            poolT, bsel,
            params["lin1_w"], params["lin1_b"].reshape(1, hidden_fc),
            params["lin2_w"], params["lin2_b"].reshape(1, n_classes),
        ]
        return pl.pallas_call(
            kernel,
            out_shape=jax.ShapeDtypeStruct((bs, n_classes), jnp.float32),
            grid=(1,),
            in_specs=[full_spec(a.shape) for a in ins],
            out_specs=full_spec((bs, n_classes)),
            compiler_params=pltpu.CompilerParams(
                dimension_semantics=("arbitrary",)),
        )(*ins)

    return forward


# ----------------------------------------------------------------------------
# One-time glue: graph / pathway constants and parameters
# ----------------------------------------------------------------------------
def build_gcn_norm(edge_index, n):
    """Dense D^-1/2 (A + I) D^-1/2, matching PyG gcn_norm (A[target, source])."""
    A = jnp.zeros((n, n), jnp.float32)
    A = A.at[edge_index[1], edge_index[0]].set(1.0)
    A = A + jnp.eye(n, dtype=jnp.float32)
    deg = jnp.sum(A, axis=1)
    dinv = jnp.where(deg > 0, 1.0 / jnp.sqrt(deg), 0.0)
    return dinv[:, None] * A * dinv[None, :]


def build_pathway_pool(row, col, n_nodes, n_cmt):
    """scatter_mean(x[row], col) as a dense matrix: Pnorm[c, n]."""
    M = jnp.zeros((n_cmt, n_nodes), jnp.float32).at[col, row].add(1.0)
    cnt = jnp.sum(M, axis=1, keepdims=True)
    return jnp.where(cnt > 0, M / cnt, 0.0)


def init_params(key, n_features, hidden_gcn, num_layers, n_cmt, hidden_fc, n_classes):
    H, L = hidden_gcn, num_layers
    HL = L * H
    ks = iter(jax.random.split(key, 16))
    p = {}
    p["w0"] = jax.random.normal(next(ks), (n_features, H), jnp.float32) / np.sqrt(n_features)
    p["b0"] = 0.01 * jax.random.normal(next(ks), (H,), jnp.float32)
    Lm1 = max(L - 1, 1)
    p["wrest"] = jax.random.normal(next(ks), (Lm1, H, H), jnp.float32) / np.sqrt(H)
    p["brest"] = 0.01 * jax.random.normal(next(ks), (Lm1, 1, H), jnp.float32)
    # fc = Linear(L*H, 1) on the torch.stack interleave (feature index h*L + l):
    # split into one (H,1) block per layer -> accumulation in-kernel is exactly
    # xcat_interleaved @ fc_w.
    fc_w_ref = jax.random.normal(next(ks), (HL,), jnp.float32) / np.sqrt(HL)
    p["fcw_blocks"] = fc_w_ref.reshape(H, L).T[:, :, None]             # (L, H, 1)
    p["fc_b"] = 0.01 * jax.random.normal(next(ks), (1,), jnp.float32)
    p["lin1_w"] = jax.random.normal(next(ks), (n_cmt, hidden_fc), jnp.float32) / np.sqrt(n_cmt)
    p["lin1_b"] = 0.01 * jax.random.normal(next(ks), (hidden_fc,), jnp.float32)
    p["lin2_w"] = jax.random.normal(next(ks), (hidden_fc, n_classes), jnp.float32) / np.sqrt(hidden_fc)
    p["lin2_b"] = 0.01 * jax.random.normal(next(ks), (n_classes,), jnp.float32)
    return p


# ----------------------------------------------------------------------------
# main
# ----------------------------------------------------------------------------
if __name__ == "__main__":
    bs = 2
    n_genes = 16          # num_nodes
    n_features = 4
    hidden_gcn = 8
    num_layers = 3
    hidden_fc = 32
    n_classes = 3
    n_cmt = 6             # number of pathway communities

    # deterministic undirected ring graph
    src = np.arange(n_genes)
    dst = (src + 1) % n_genes
    edge_index = jnp.asarray(
        np.stack([np.concatenate([src, dst]), np.concatenate([dst, src])], 0),
        dtype=jnp.int32)

    # deterministic pathway membership: gene n belongs to community n % n_cmt
    row = jnp.asarray(np.arange(n_genes), jnp.int32)
    col = jnp.asarray(np.arange(n_genes) % n_cmt, jnp.int32)

    ahat = build_gcn_norm(edge_index, n_genes)                     # (N, N)
    pnorm = build_pathway_pool(row, col, n_genes, n_cmt)           # (n_cmt, N)

    # batch-collapsed constants (rows indexed b*N + n)
    abd = jnp.kron(jnp.eye(bs, dtype=jnp.float32), ahat)           # (bs*N, bs*N)
    poolT = jnp.tile(pnorm.T, (bs, 1))                             # (bs*N, n_cmt)
    bsel = jnp.kron(jnp.eye(bs, dtype=jnp.float32),
                    jnp.ones((1, n_genes), jnp.float32))           # (bs, bs*N)

    key = jax.random.PRNGKey(0)
    kx, kp = jax.random.split(key)
    x = jax.random.normal(kx, (bs, n_genes, n_features), jnp.float32)
    batch = jnp.zeros((bs * n_genes,), jnp.int32)  # parity with reference signature (unused)

    params = init_params(kp, n_features, hidden_gcn, num_layers, n_cmt, hidden_fc, n_classes)

    forward = jax.jit(make_forward(bs, n_genes, n_features, hidden_gcn,
                                   num_layers, n_cmt, hidden_fc, n_classes))
    out = forward(x, params, (abd, poolT, bsel))
    out = jax.block_until_ready(out)

    assert out.shape == (bs, n_classes)
    assert bool(jnp.all(jnp.isfinite(out)))
    # log_softmax rows must sum to 1 in probability space
    assert bool(jnp.all(jnp.abs(jnp.sum(jnp.exp(out), axis=-1) - 1.0) < 1e-4))
    print("KERNEL_OK")
</pallas_src>

<mosaic_0001>
module attributes {stable_mosaic.version = 11 : i64} {
  func.func @kernel(%arg0: i32, %arg1: memref<32x4xf32, #tpu.memory_space<vmem>>, %arg2: memref<32x32xf32, #tpu.memory_space<vmem>>, %arg3: memref<4x8xf32, #tpu.memory_space<vmem>>, %arg4: memref<1x8xf32, #tpu.memory_space<vmem>>, %arg5: memref<2x8x8xf32, #tpu.memory_space<vmem>>, %arg6: memref<2x1x8xf32, #tpu.memory_space<vmem>>, %arg7: memref<3x8x1xf32, #tpu.memory_space<vmem>>, %arg8: memref<1x6xf32, #tpu.memory_space<vmem>>, %arg9: memref<32x6xf32, #tpu.memory_space<vmem>>, %arg10: memref<2x32xf32, #tpu.memory_space<vmem>>, %arg11: memref<6x32xf32, #tpu.memory_space<vmem>>, %arg12: memref<1x32xf32, #tpu.memory_space<vmem>>, %arg13: memref<32x3xf32, #tpu.memory_space<vmem>>, %arg14: memref<1x3xf32, #tpu.memory_space<vmem>>, %arg15: memref<2x3xf32, #tpu.memory_space<vmem>>) attributes {dimension_semantics = [#tpu.dimension_semantics<arbitrary>], iteration_bounds = array<i64: 1>, scalar_prefetch = 0 : i64, scratch_operands = 0 : i64, tpu.core_type = #tpu.core_type<tc>, window_params = [{pipeline_mode = #tpu.pipeline_mode<synchronous>, transform_indices = @transform_0, window_bounds = array<i64: 32, 4>}, {pipeline_mode = #tpu.pipeline_mode<synchronous>, transform_indices = @transform_1, window_bounds = array<i64: 32, 32>}, {pipeline_mode = #tpu.pipeline_mode<synchronous>, transform_indices = @transform_2, window_bounds = array<i64: 4, 8>}, {pipeline_mode = #tpu.pipeline_mode<synchronous>, transform_indices = @transform_3, window_bounds = array<i64: 1, 8>}, {pipeline_mode = #tpu.pipeline_mode<synchronous>, transform_indices = @transform_4, window_bounds = array<i64: 2, 8, 8>}, {pipeline_mode = #tpu.pipeline_mode<synchronous>, transform_indices = @transform_5, window_bounds = array<i64: 2, 1, 8>}, {pipeline_mode = #tpu.pipeline_mode<synchronous>, transform_indices = @transform_6, window_bounds = array<i64: 3, 8, 1>}, {pipeline_mode = #tpu.pipeline_mode<synchronous>, transform_indices = @transform_7, window_bounds = array<i64: 1, 6>}, {pipeline_mode = #tpu.pipeline_mode<synchronous>, transform_indices = @transform_8, window_bounds = array<i64: 32, 6>}, {pipeline_mode = #tpu.pipeline_mode<synchronous>, transform_indices = @transform_9, window_bounds = array<i64: 2, 32>}, {pipeline_mode = #tpu.pipeline_mode<synchronous>, transform_indices = @transform_10, window_bounds = array<i64: 6, 32>}, {pipeline_mode = #tpu.pipeline_mode<synchronous>, transform_indices = @transform_11, window_bounds = array<i64: 1, 32>}, {pipeline_mode = #tpu.pipeline_mode<synchronous>, transform_indices = @transform_12, window_bounds = array<i64: 32, 3>}, {pipeline_mode = #tpu.pipeline_mode<synchronous>, transform_indices = @transform_13, window_bounds = array<i64: 1, 3>}, {pipeline_mode = #tpu.pipeline_mode<synchronous>, transform_indices = @transform_14, window_bounds = array<i64: 2, 3>}]} {
    %c0 = arith.constant 0 : index
    %c0_0 = arith.constant 0 : index
    %0 = vector.load %arg2[%c0, %c0_0] : memref<32x32xf32, #tpu.memory_space<vmem>>, vector<32x32xf32>
    %c0_1 = arith.constant 0 : index
    %c0_2 = arith.constant 0 : index
    %1 = vector.load %arg1[%c0_1, %c0_2] : memref<32x4xf32, #tpu.memory_space<vmem>>, vector<32x4xf32>
    %cst = arith.constant dense<0.000000e+00> : vector<32x4xf32>
    %2 = tpu.matmul %0, %1, %cst {dimension_numbers = #tpu.dot_dimension_numbers<[1], [0], [0], [1], [0, 0, 1, 1], [], []>} : vector<32x32xf32>, vector<32x4xf32>, vector<32x4xf32> -> vector<32x4xf32>
    %c0_3 = arith.constant 0 : index
    %c0_4 = arith.constant 0 : index
    %3 = vector.load %arg3[%c0_3, %c0_4] : memref<4x8xf32, #tpu.memory_space<vmem>>, vector<4x8xf32>
    %cst_5 = arith.constant dense<0.000000e+00> : vector<32x8xf32>
    %4 = tpu.matmul %2, %3, %cst_5 {dimension_numbers = #tpu.dot_dimension_numbers<[1], [0], [0], [1], [0, 0, 1, 1], [], []>} : vector<32x4xf32>, vector<4x8xf32>, vector<32x8xf32> -> vector<32x8xf32>
    %c0_6 = arith.constant 0 : index
    %c0_7 = arith.constant 0 : index
    %5 = vector.load %arg4[%c0_6, %c0_7] : memref<1x8xf32, #tpu.memory_space<vmem>>, vector<1x8xf32>
    %6 = vector.broadcast %5 : vector<1x8xf32> to vector<32x8xf32>
    %7 = arith.addf %4, %6 : vector<32x8xf32>
    %cst_8 = arith.constant 0.000000e+00 : f32
    %8 = vector.broadcast %cst_8 : f32 to vector<32x8xf32>
    %9 = arith.maximumf %7, %8 : vector<32x8xf32>
    %c0_9 = arith.constant 0 : index
    %c0_10 = arith.constant 0 : index
    %c0_11 = arith.constant 0 : index
    %10 = vector.load %arg7[%c0_9, %c0_10, %c0_11] : memref<3x8x1xf32, #tpu.memory_space<vmem>>, vector<1x8x1xf32>
    %11 = vector.shape_cast %10 : vector<1x8x1xf32> to vector<8x1xf32>
    %cst_12 = arith.constant dense<0.000000e+00> : vector<32x1xf32>
    %12 = tpu.matmul %9, %11, %cst_12 {dimension_numbers = #tpu.dot_dimension_numbers<[1], [0], [0], [1], [0, 0, 1, 1], [], []>} : vector<32x8xf32>, vector<8x1xf32>, vector<32x1xf32> -> vector<32x1xf32>
    %c0_13 = arith.constant 0 : index
    %c0_14 = arith.constant 0 : index
    %c0_15 = arith.constant 0 : index
    %13 = vector.load %arg5[%c0_13, %c0_14, %c0_15] : memref<2x8x8xf32, #tpu.memory_space<vmem>>, vector<1x8x8xf32>
    %14 = vector.shape_cast %13 : vector<1x8x8xf32> to vector<8x8xf32>
    %cst_16 = arith.constant dense<0.000000e+00> : vector<32x8xf32>
    %15 = tpu.matmul %9, %14, %cst_16 {dimension_numbers = #tpu.dot_dimension_numbers<[1], [0], [0], [1], [0, 0, 1, 1], [], []>} : vector<32x8xf32>, vector<8x8xf32>, vector<32x8xf32> -> vector<32x8xf32>
    %cst_17 = arith.constant dense<0.000000e+00> : vector<32x8xf32>
    %16 = tpu.matmul %0, %15, %cst_17 {dimension_numbers = #tpu.dot_dimension_numbers<[1], [0], [0], [1], [0, 0, 1, 1], [], []>} : vector<32x32xf32>, vector<32x8xf32>, vector<32x8xf32> -> vector<32x8xf32>
    %c0_18 = arith.constant 0 : index
    %c0_19 = arith.constant 0 : index
    %c0_20 = arith.constant 0 : index
    %17 = vector.load %arg6[%c0_18, %c0_19, %c0_20] : memref<2x1x8xf32, #tpu.memory_space<vmem>>, vector<1x1x8xf32>
    %18 = vector.shape_cast %17 : vector<1x1x8xf32> to vector<1x8xf32>
    %19 = vector.broadcast %18 : vector<1x8xf32> to vector<32x8xf32>
    %20 = arith.addf %16, %19 : vector<32x8xf32>
    %cst_21 = arith.constant 0.000000e+00 : f32
    %21 = vector.broadcast %cst_21 : f32 to vector<32x8xf32>
    %22 = arith.maximumf %20, %21 : vector<32x8xf32>
    %c1 = arith.constant 1 : index
    %c0_22 = arith.constant 0 : index
    %c0_23 = arith.constant 0 : index
    %23 = vector.load %arg7[%c1, %c0_22, %c0_23] : memref<3x8x1xf32, #tpu.memory_space<vmem>>, vector<1x8x1xf32>
    %24 = vector.shape_cast %23 : vector<1x8x1xf32> to vector<8x1xf32>
    %cst_24 = arith.constant dense<0.000000e+00> : vector<32x1xf32>
    %25 = tpu.matmul %22, %24, %cst_24 {dimension_numbers = #tpu.dot_dimension_numbers<[1], [0], [0], [1], [0, 0, 1, 1], [], []>} : vector<32x8xf32>, vector<8x1xf32>, vector<32x1xf32> -> vector<32x1xf32>
    %26 = arith.addf %12, %25 : vector<32x1xf32>
    %c1_25 = arith.constant 1 : index
    %c0_26 = arith.constant 0 : index
    %c0_27 = arith.constant 0 : index
    %27 = vector.load %arg5[%c1_25, %c0_26, %c0_27] : memref<2x8x8xf32, #tpu.memory_space<vmem>>, vector<1x8x8xf32>
    %28 = vector.shape_cast %27 : vector<1x8x8xf32> to vector<8x8xf32>
    %cst_28 = arith.constant dense<0.000000e+00> : vector<32x8xf32>
    %29 = tpu.matmul %22, %28, %cst_28 {dimension_numbers = #tpu.dot_dimension_numbers<[1], [0], [0], [1], [0, 0, 1, 1], [], []>} : vector<32x8xf32>, vector<8x8xf32>, vector<32x8xf32> -> vector<32x8xf32>
    %cst_29 = arith.constant dense<0.000000e+00> : vector<32x8xf32>
    %30 = tpu.matmul %0, %29, %cst_29 {dimension_numbers = #tpu.dot_dimension_numbers<[1], [0], [0], [1], [0, 0, 1, 1], [], []>} : vector<32x32xf32>, vector<32x8xf32>, vector<32x8xf32> -> vector<32x8xf32>
    %c1_30 = arith.constant 1 : index
    %c0_31 = arith.constant 0 : index
    %c0_32 = arith.constant 0 : index
    %31 = vector.load %arg6[%c1_30, %c0_31, %c0_32] : memref<2x1x8xf32, #tpu.memory_space<vmem>>, vector<1x1x8xf32>
    %32 = vector.shape_cast %31 : vector<1x1x8xf32> to vector<1x8xf32>
    %33 = vector.broadcast %32 : vector<1x8xf32> to vector<32x8xf32>
    %34 = arith.addf %30, %33 : vector<32x8xf32>
    %cst_33 = arith.constant 0.000000e+00 : f32
    %35 = vector.broadcast %cst_33 : f32 to vector<32x8xf32>
    %36 = arith.maximumf %34, %35 : vector<32x8xf32>
    %c2 = arith.constant 2 : index
    %c0_34 = arith.constant 0 : index
    %c0_35 = arith.constant 0 : index
    %37 = vector.load %arg7[%c2, %c0_34, %c0_35] : memref<3x8x1xf32, #tpu.memory_space<vmem>>, vector<1x8x1xf32>
    %38 = vector.shape_cast %37 : vector<1x8x1xf32> to vector<8x1xf32>
    %cst_36 = arith.constant dense<0.000000e+00> : vector<32x1xf32>
    %39 = tpu.matmul %36, %38, %cst_36 {dimension_numbers = #tpu.dot_dimension_numbers<[1], [0], [0], [1], [0, 0, 1, 1], [], []>} : vector<32x8xf32>, vector<8x1xf32>, vector<32x1xf32> -> vector<32x1xf32>
    %40 = arith.addf %26, %39 : vector<32x1xf32>
    %c0_37 = arith.constant 0 : index
    %c0_38 = arith.constant 0 : index
    %41 = vector.load %arg9[%c0_37, %c0_38] : memref<32x6xf32, #tpu.memory_space<vmem>>, vector<32x6xf32>
    %42 = vector.broadcast %40 : vector<32x1xf32> to vector<32x6xf32>
    %43 = arith.mulf %41, %42 : vector<32x6xf32>
    %c0_39 = arith.constant 0 : index
    %c0_40 = arith.constant 0 : index
    %44 = vector.load %arg10[%c0_39, %c0_40] : memref<2x32xf32, #tpu.memory_space<vmem>>, vector<2x32xf32>
    %cst_41 = arith.constant dense<0.000000e+00> : vector<2x6xf32>
    %45 = tpu.matmul %44, %43, %cst_41 {dimension_numbers = #tpu.dot_dimension_numbers<[1], [0], [0], [1], [0, 0, 1, 1], [], []>} : vector<2x32xf32>, vector<32x6xf32>, vector<2x6xf32> -> vector<2x6xf32>
    %c0_42 = arith.constant 0 : index
    %c0_43 = arith.constant 0 : index
    %46 = vector.load %arg8[%c0_42, %c0_43] : memref<1x6xf32, #tpu.memory_space<vmem>>, vector<1x6xf32>
    %47 = vector.broadcast %46 : vector<1x6xf32> to vector<2x6xf32>
    %48 = arith.addf %45, %47 : vector<2x6xf32>
    %c0_44 = arith.constant 0 : index
    %c0_45 = arith.constant 0 : index
    %49 = vector.load %arg11[%c0_44, %c0_45] : memref<6x32xf32, #tpu.memory_space<vmem>>, vector<6x32xf32>
    %cst_46 = arith.constant dense<0.000000e+00> : vector<2x32xf32>
    %50 = tpu.matmul %48, %49, %cst_46 {dimension_numbers = #tpu.dot_dimension_numbers<[1], [0], [0], [1], [0, 0, 1, 1], [], []>} : vector<2x6xf32>, vector<6x32xf32>, vector<2x32xf32> -> vector<2x32xf32>
    %c0_47 = arith.constant 0 : index
    %c0_48 = arith.constant 0 : index
    %51 = vector.load %arg12[%c0_47, %c0_48] : memref<1x32xf32, #tpu.memory_space<vmem>>, vector<1x32xf32>
    %52 = vector.broadcast %51 : vector<1x32xf32> to vector<2x32xf32>
    %53 = arith.addf %50, %52 : vector<2x32xf32>
    %cst_49 = arith.constant 0.000000e+00 : f32
    %54 = vector.broadcast %cst_49 : f32 to vector<2x32xf32>
    %55 = arith.maximumf %53, %54 : vector<2x32xf32>
    %c0_50 = arith.constant 0 : index
    %c0_51 = arith.constant 0 : index
    %56 = vector.load %arg13[%c0_50, %c0_51] : memref<32x3xf32, #tpu.memory_space<vmem>>, vector<32x3xf32>
    %cst_52 = arith.constant dense<0.000000e+00> : vector<2x3xf32>
    %57 = tpu.matmul %55, %56, %cst_52 {dimension_numbers = #tpu.dot_dimension_numbers<[1], [0], [0], [1], [0, 0, 1, 1], [], []>} : vector<2x32xf32>, vector<32x3xf32>, vector<2x3xf32> -> vector<2x3xf32>
    %c0_53 = arith.constant 0 : index
    %c0_54 = arith.constant 0 : index
    %58 = vector.load %arg14[%c0_53, %c0_54] : memref<1x3xf32, #tpu.memory_space<vmem>>, vector<1x3xf32>
    %59 = vector.broadcast %58 : vector<1x3xf32> to vector<2x3xf32>
    %60 = arith.addf %57, %59 : vector<2x3xf32>
    %cst_55 = arith.constant dense<0xFF800000> : vector<2xf32>
    %61 = vector.multi_reduction <maximumf>, %60, %cst_55 [1] : vector<2x3xf32> to vector<2xf32>
    %62 = vector.shape_cast %61 : vector<2xf32> to vector<2x1xf32>
    %63 = vector.broadcast %62 : vector<2x1xf32> to vector<2x3xf32>
    %64 = arith.subf %60, %63 : vector<2x3xf32>
    %65 = math.exp %64 : vector<2x3xf32>
    %cst_56 = arith.constant dense<0.000000e+00> : vector<2xf32>
    %66 = vector.multi_reduction <add>, %65, %cst_56 [1] : vector<2x3xf32> to vector<2xf32>
    %67 = vector.shape_cast %66 : vector<2xf32> to vector<2x1xf32>
    %68 = math.log %67 : vector<2x1xf32>
    %69 = vector.broadcast %68 : vector<2x1xf32> to vector<2x3xf32>
    %70 = arith.subf %64, %69 : vector<2x3xf32>
    %c0_57 = arith.constant 0 : index
    %c0_58 = arith.constant 0 : index
    %71 = vector.load %arg15[%c0_57, %c0_58] : memref<2x3xf32, #tpu.memory_space<vmem>>, vector<2x3xf32>
    tpu.vector_store %arg15[%c0_57, %c0_58], %70 {strides = array<i32>} : memref<2x3xf32, #tpu.memory_space<vmem>>, vector<2x3xf32>,
    return
  }
  func.func @transform_0(%arg0: i32) -> (i32, i32) {
    %c0_i32 = arith.constant 0 : i32
    %c0_i32_0 = arith.constant 0 : i32
    %c0_i32_1 = arith.constant 0 : i32
    return %c0_i32, %c0_i32_0 : i32, i32
  }
  func.func @transform_1(%arg0: i32) -> (i32, i32) {
    %c0_i32 = arith.constant 0 : i32
    %c0_i32_0 = arith.constant 0 : i32
    %c0_i32_1 = arith.constant 0 : i32
    return %c0_i32, %c0_i32_0 : i32, i32
  }
  func.func @transform_2(%arg0: i32) -> (i32, i32) {
    %c0_i32 = arith.constant 0 : i32
    %c0_i32_0 = arith.constant 0 : i32
    %c0_i32_1 = arith.constant 0 : i32
    return %c0_i32, %c0_i32_0 : i32, i32
  }
  func.func @transform_3(%arg0: i32) -> (i32, i32) {
    %c0_i32 = arith.constant 0 : i32
    %c0_i32_0 = arith.constant 0 : i32
    %c0_i32_1 = arith.constant 0 : i32
    return %c0_i32, %c0_i32_0 : i32, i32
  }
  func.func @transform_4(%arg0: i32) -> (i32, i32, i32) {
    %c0_i32 = arith.constant 0 : i32
    %c0_i32_0 = arith.constant 0 : i32
    %c0_i32_1 = arith.constant 0 : i32
    %c0_i32_2 = arith.constant 0 : i32
    return %c0_i32, %c0_i32_0, %c0_i32_1 : i32, i32, i32
  }
  func.func @transform_5(%arg0: i32) -> (i32, i32, i32) {
    %c0_i32 = arith.constant 0 : i32
    %c0_i32_0 = arith.constant 0 : i32
    %c0_i32_1 = arith.constant 0 : i32
    %c0_i32_2 = arith.constant 0 : i32
    return %c0_i32, %c0_i32_0, %c0_i32_1 : i32, i32, i32
  }
  func.func @transform_6(%arg0: i32) -> (i32, i32, i32) {
    %c0_i32 = arith.constant 0 : i32
    %c0_i32_0 = arith.constant 0 : i32
    %c0_i32_1 = arith.constant 0 : i32
    %c0_i32_2 = arith.constant 0 : i32
    return %c0_i32, %c0_i32_0, %c0_i32_1 : i32, i32, i32
  }
  func.func @transform_7(%arg0: i32) -> (i32, i32) {
    %c0_i32 = arith.constant 0 : i32
    %c0_i32_0 = arith.constant 0 : i32
    %c0_i32_1 = arith.constant 0 : i32
    return %c0_i32, %c0_i32_0 : i32, i32
  }
  func.func @transform_8(%arg0: i32) -> (i32, i32) {
    %c0_i32 = arith.constant 0 : i32
    %c0_i32_0 = arith.constant 0 : i32
    %c0_i32_1 = arith.constant 0 : i32
    return %c0_i32, %c0_i32_0 : i32, i32
  }
  func.func @transform_9(%arg0: i32) -> (i32, i32) {
    %c0_i32 = arith.constant 0 : i32
    %c0_i32_0 = arith.constant 0 : i32
    %c0_i32_1 = arith.constant 0 : i32
    return %c0_i32, %c0_i32_0 : i32, i32
  }
  func.func @transform_10(%arg0: i32) -> (i32, i32) {
    %c0_i32 = arith.constant 0 : i32
    %c0_i32_0 = arith.constant 0 : i32
    %c0_i32_1 = arith.constant 0 : i32
    return %c0_i32, %c0_i32_0 : i32, i32
  }
  func.func @transform_11(%arg0: i32) -> (i32, i32) {
    %c0_i32 = arith.constant 0 : i32
    %c0_i32_0 = arith.constant 0 : i32
    %c0_i32_1 = arith.constant 0 : i32
    return %c0_i32, %c0_i32_0 : i32, i32
  }
  func.func @transform_12(%arg0: i32) -> (i32, i32) {
    %c0_i32 = arith.constant 0 : i32
    %c0_i32_0 = arith.constant 0 : i32
    %c0_i32_1 = arith.constant 0 : i32
    return %c0_i32, %c0_i32_0 : i32, i32
  }
  func.func @transform_13(%arg0: i32) -> (i32, i32) {
    %c0_i32 = arith.constant 0 : i32
    %c0_i32_0 = arith.constant 0 : i32
    %c0_i32_1 = arith.constant 0 : i32
    return %c0_i32, %c0_i32_0 : i32, i32
  }
  func.func @transform_14(%arg0: i32) -> (i32, i32) {
    %c0_i32 = arith.constant 0 : i32
    %c0_i32_0 = arith.constant 0 : i32
    %c0_i32_1 = arith.constant 0 : i32
    return %c0_i32, %c0_i32_0 : i32, i32
  }
}

</mosaic_0001>

<bundles_post_ra>
// kernel: forward.1
= control target key start
LH: loop header
LB: loop body
LE: loop exit
PB: predicated region body
PF: predicated region fallthrough
CT: control target
= control target key end

     0   :  { %s886_s0 = inlined_call_operand.vmem [shape: f32[32,4], index: 0, kind: input, shape index: {}]   ;;  %s887_s1 = inlined_call_operand.vmem [shape: f32[32,32], index: 1, kind: input, shape index: {}]   ;;  %s888_s2 = inlined_call_operand.vmem [shape: f32[4,8], index: 2, kind: input, shape index: {}]   ;;  %s889_s3 = inlined_call_operand.vmem [shape: f32[1,8], index: 3, kind: input, shape index: {}]   ;;  %s890_s4 = inlined_call_operand.vmem [shape: f32[2,8,8], index: 4, kind: input, shape index: {}]   ;;  %s891_s5 = inlined_call_operand.vmem [shape: f32[2,1,8], index: 5, kind: input, shape index: {}]   ;;  %s892_s6 = inlined_call_operand.vmem [shape: f32[3,8,1], index: 6, kind: input, shape index: {}]   ;;  %s893_s7 = inlined_call_operand.vmem [shape: f32[1,6], index: 7, kind: input, shape index: {}]   ;;  %s894_s8 = inlined_call_operand.vmem [shape: f32[32,6], index: 8, kind: input, shape index: {}]   ;;  %s895_s9 = inlined_call_operand.vmem [shape: f32[2,32], index: 9, kind: input, shape index: {}]   ;;  %s896_s10 = inlined_call_operand.vmem [shape: f32[6,32], index: 10, kind: input, shape index: {}]   ;;  %s897_s11 = inlined_call_operand.vmem [shape: f32[1,32], index: 11, kind: input, shape index: {}]   ;;  %s898_s12 = inlined_call_operand.vmem [shape: f32[32,3], index: 12, kind: input, shape index: {}]   ;;  %s899_s13 = inlined_call_operand.vmem [shape: f32[1,3], index: 13, kind: input, shape index: {}]   ;;  %s900_s14 = inlined_call_operand.hbm [shape: f32[2,3], index: 14, kind: output, shape index: {}]  }
   0x1   :  { %v55_v0 = vld [vmem:[%s886_s0 + $0x18] sm:$0xff]  ;;  %v54_v1 = vld [vmem:[%s886_s0 + $0x10] sm:$0xff]  ;;  %v53_v2 = vld [vmem:[%s886_s0 + $0x8] sm:$0xff] }
   0x2   :  { %81 = vmatpush.msra.mxu0 %v55_v0  ;;  %v52_v3 = vld [vmem:[%s886_s0] sm:$0xff] }
   0x4   :  { %82 = vmatpush.msra.mxu0 %v54_v1 }
   0x5   :  { %19 = vsyncpa [#allocation3], 0  ;;  %v751_v4 = vld [vmem:[%s887_s1] sm:$0xff]  ;;  %vm56_vm0 = vcmask 261120   ;;  %v758_v5 = vld [vmem:[%s887_s1 + $0x8] sm:$0xff]  ;;  %vm116_vm1 = vcmask 1043456  }
   0x6   :  { %83 = vmatpush.msra.mxu0 %v53_v2  ;;  %v765_v6 = vld [vmem:[%s887_s1 + $0x10] sm:$0xff]  ;;  %v772_v7 = vld [vmem:[%s887_s1 + $0x18] sm:$0xff]  ;;  %v98_v8 = vld [vmem:[%s888_s2] sm:$0xf]  ;;  %vm103_vm2 = vcmask 31744   ;;  %vm155_vm3 = vcmask 64512  }
   0x7   :  { %577 = vmatpush.msk.msra.mxu1 %vm116_vm1, %v98_v8  ;;  %618 = vmatpush.msk.msra.mxu2 %vm116_vm1, %v98_v8  ;;  %v154_v13 = vld [vmem:[%s890_s4] sm:$0xff]  ;;  %v599_v32 = vld [vmem:[%s890_s4 + $0x8] sm:$0xff]  ;;  %v609_v51 = vld [vmem:[%s892_s6 + $0x10] sm:$0xff]  ;;  %vm487_vm4 = vcmask 1045504   ;;  %vm483_vm5 = vcmask 48128   ;;  %vm543_vm6 = vcmask 17408  }
   0x8   :  { %84 = vmatpush.msra.mxu0 %v52_v3  ;;  %v623_v14 = vld [vmem:[%s889_s3] ss:$0 sm:$0xff]  ;;  %v590_v33 = vld [vmem:[%s892_s6 + $0x8] sm:$0xff]  ;;  %v625_v52 = vld [vmem:[%s891_s5 + $0x1] ss:$0 sm:$0xff]  ;;  %v659_v3 = vmov 0  }
   0x9   :  { %573 = vmatmul.msk.f32.vlgmr.msra.gmra.mxu0 %vm56_vm0, %v751_v4  ;;  %183 = vmatpush.msrb.mxu2 %v154_v13  ;;  %v153_v18 = vld [vmem:[%s892_s6] sm:$0xff] }
   0xa   :  { %323 = vmatpush.msrb.mxu0 %v599_v32  ;;  %263 = vmatpush.msrb.mxu1 %v590_v33  ;;  %v624_v34 = vld [vmem:[%s891_s5] ss:$0 sm:$0xff]  ;;  %s564_s5 = sshll.u32 %s900_s14, 4  ;;  %s565_s5 = int_to_ptr.hbm [resolvable:$true] %s564_s5 }
   0xb   :  { %622 = vset.pattern.permute.xlu1 %v659_v3  ;;  %621 = vset.pattern.permute.xlu0 %v659_v3 }
  0x11   :  { %574 = vmatmul.msk.f32.gmra.mxu0 %vm56_vm0, %v758_v5 }
  0x19   :  { %575 = vmatmul.msk.f32.gmra.mxu0 %vm56_vm0, %v765_v6 }
  0x21   :  { %576 = vmatmul.msk.f32.gmra.mxu0 %vm56_vm0, %v772_v7 }
  0x86   :  { %v86_v9 = vpop.f32.mrf.mxu0 }
  0x87   :  { %578 = vmatmul.msk.f32.vlgmr.msra.gmra.mxu1 %vm103_vm2, %v86_v9 }
  0x88   :  { %404 = vmatpush.msra.mxu1 %v609_v51 }
  0x8e   :  { %v89_v10 = vpop.f32.mrf.mxu0 }
  0x8f   :  { %579 = vmatmul.msk.f32.gmra.mxu1 %vm103_vm2, %v89_v10 }
  0x96   :  { %v92_v11 = vpop.f32.mrf.mxu0 }
  0x97   :  { %580 = vmatmul.msk.f32.gmra.mxu1 %vm103_vm2, %v92_v11 }
  0x9e   :  { %v95_v12 = vpop.f32.mrf.mxu0 }
  0x9f   :  { %581 = vmatmul.msk.f32.vlgmr.msra.gmra.mxu2 %vm103_vm2, %v95_v12 }
  0xa0   :  { %292 = vmatpush.msra.mxu2 %v153_v18 }
 0x104   :  { %v137_v15 = vpop.f32.mrf.mxu1 }
 0x105   :  { %v138_v16 = vadd.f32 %v623_v14, %v137_v15 }
 0x107   :  { %v149_v17 = vmax.f32 %v138_v16, 0.0 }
 0x109   :  { %582 = vmatmul.msk.f32.vlgmr.msrb.gmra.mxu2 %vm155_vm3, %v149_v17 }
 0x10c   :  { %v140_v19 = vpop.f32.mrf.mxu1 }
 0x10d   :  { %v141_v20 = vadd.f32 %v623_v14, %v140_v19 }
 0x10f   :  { %v150_v21 = vmax.f32 %v141_v20, 0.0 }
 0x111   :  { %583 = vmatmul.msk.f32.gmra.mxu2 %vm155_vm3, %v150_v21 }
 0x114   :  { %v143_v22 = vpop.f32.mrf.mxu1 }
 0x115   :  { %v144_v23 = vadd.f32 %v623_v14, %v143_v22  ;;  %v478_v22 = vld [vmem:[%s896_s10] sm:$0x3f] }
 0x116   :  { %615 = vmatpush.msk.msra.mxu0 %vm487_vm4, %v478_v22 }
 0x117   :  { %v151_v24 = vmax.f32 %v144_v23, 0.0  ;;  %v425_v23 = vld [vmem:[%s894_s8 + $0x18] sm:$0xff] }
 0x119   :  { %584 = vmatmul.msk.f32.gmra.mxu2 %vm155_vm3, %v151_v24 }
 0x122   :  { %v146_v25 = vpop.f32.mrf.mxu2 }
 0x123   :  { %v147_v26 = vadd.f32 %v623_v14, %v146_v25 }
 0x125   :  { %v152_v27 = vmax.f32 %v147_v26, 0.0 }
 0x127   :  { %585 = vmatmul.msk.f32.gmra.mxu2 %vm155_vm3, %v152_v27 }
 0x12f   :  { %595 = vmatmul.msk.f32.vlgmr.msra.gmra.mxu2 %vm155_vm3, %v149_v17 }
 0x137   :  { %596 = vmatmul.msk.f32.gmra.mxu2 %vm155_vm3, %v150_v21 }
 0x13f   :  { %597 = vmatmul.msk.f32.gmra.mxu2 %vm155_vm3, %v151_v24 }
 0x147   :  { %598 = vmatmul.msk.f32.gmra.mxu2 %vm155_vm3, %v152_v27  ;;  %v424_v27 = vld [vmem:[%s894_s8 + $0x10] sm:$0xff] }
 0x18c   :  { %v185_v28 = vpop.f32.mrf.mxu2 }
 0x194   :  { %v188_v29 = vpop.f32.mrf.mxu2 }
 0x19c   :  { %v191_v30 = vpop.f32.mrf.mxu2 }
 0x1aa   :  { %v194_v31 = vpop.f32.mrf.mxu2 }
 0x1ab   :  { %213 = vmatpush.msra.mxu3 %v194_v31  ;;  %v422_v31 = vld [vmem:[%s894_s8] sm:$0xff] }
 0x1ad   :  { %214 = vmatpush.msra.mxu3 %v191_v30 }
 0x1af   :  { %215 = vmatpush.msra.mxu3 %v188_v29 }
 0x1b1   :  { %216 = vmatpush.msra.mxu3 %v185_v28  ;;  %v423_v28 = vld [vmem:[%s894_s8 + $0x8] sm:$0xff] }
 0x1b2   :  { %586 = vmatmul.msk.f32.vlgmr.msra.gmra.mxu3 %vm56_vm0, %v751_v4 }
 0x1ba   :  { %587 = vmatmul.msk.f32.gmra.mxu3 %vm56_vm0, %v758_v5 }
 0x1c2   :  { %588 = vmatmul.msk.f32.gmra.mxu3 %vm56_vm0, %v765_v6 }
 0x1ca   :  { %589 = vmatmul.msk.f32.gmra.mxu3 %vm56_vm0, %v772_v7 }
 0x235   :  { %v218_v35 = vpop.f32.mrf.mxu3 }
 0x236   :  { %v219_v36 = vadd.f32 %v624_v34, %v218_v35  ;;  %v450_v35 = vld [vmem:[%s895_s9] sm:$0x3] }
 0x238   :  { %v230_v37 = vmax.f32 %v219_v36, 0.0  ;;  %v515_v36 = vld [vmem:[%s898_s12 + $0x18] sm:$0xff] }
 0x23a   :  { %591 = vmatmul.msk.f32.vlgmr.msrb.gmra.mxu1 %vm155_vm3, %v230_v37  ;;  %600 = vmatmul.msk.f32.vlgmr.msrb.gmra.mxu0 %vm155_vm3, %v230_v37  ;;  %v626_v37 = vld [vmem:[%s893_s7] ss:$0 sm:$0xff] }
 0x23d   :  { %v221_v38 = vpop.f32.mrf.mxu3 }
 0x23e   :  { %v222_v39 = vadd.f32 %v624_v34, %v221_v38 }
 0x240   :  { %v231_v40 = vmax.f32 %v222_v39, 0.0 }
 0x242   :  { %592 = vmatmul.msk.f32.gmra.mxu1 %vm155_vm3, %v231_v40  ;;  %601 = vmatmul.msk.f32.gmra.mxu0 %vm155_vm3, %v231_v40  ;;  %v514_v40 = vld [vmem:[%s898_s12 + $0x10] sm:$0xff] }
 0x245   :  { %v224_v41 = vpop.f32.mrf.mxu3 }
 0x246   :  { %v225_v42 = vadd.f32 %v624_v34, %v224_v41  ;;  %v513_v41 = vld [vmem:[%s898_s12 + $0x8] sm:$0xff] }
 0x248   :  { %v232_v43 = vmax.f32 %v225_v42, 0.0  ;;  %v512_v42 = vld [vmem:[%s898_s12] sm:$0xff] }
 0x24a   :  { %593 = vmatmul.msk.f32.gmra.mxu1 %vm155_vm3, %v232_v43  ;;  %602 = vmatmul.msk.f32.gmra.mxu0 %vm155_vm3, %v232_v43  ;;  %v627_v43 = vld [vmem:[%s897_s11] ss:$0 sm:$0xff]  ;;  %s660_s11 = smov [#allocation2]  }
 0x24b   :  { %s562_s12 = sshll.u32 %s660_s11, 4  ;;  %s563_s12 = int_to_ptr.vmem [resolvable:$true] %s562_s12 }
 0x24d   :  { %v227_v44 = vpop.f32.mrf.mxu3 }
 0x24e   :  { %v228_v45 = vadd.f32 %v624_v34, %v227_v44 }
 0x250   :  { %v233_v46 = vmax.f32 %v228_v45, 0.0 }
 0x252   :  { %594 = vmatmul.msk.f32.gmra.mxu1 %vm155_vm3, %v233_v46  ;;  %603 = vmatmul.msk.f32.gmra.mxu0 %vm155_vm3, %v233_v46 }
 0x2b7   :  { %v325_v47 = vpop.f32.mrf.mxu0  ;;  %v265_v1 = vpop.f32.mrf.mxu1 }
 0x2bf   :  { %v328_v48 = vpop.f32.mrf.mxu0  ;;  %v268_v2 = vpop.f32.mrf.mxu1 }
 0x2c7   :  { %v331_v49 = vpop.f32.mrf.mxu0 }
 0x2cf   :  { %v334_v50 = vpop.f32.mrf.mxu0 }
 0x2d0   :  { %354 = vmatpush.msrb.mxu3 %v334_v50 }
 0x2d2   :  { %355 = vmatpush.msrb.mxu3 %v331_v49 }
 0x2d4   :  { %356 = vmatpush.msrb.mxu3 %v328_v48 }
 0x2d6   :  { %357 = vmatpush.msrb.mxu3 %v325_v47  ;;  %v628_v47 = vld [vmem:[%s899_s13] ss:$0 sm:$0xff] }
 0x2d7   :  { %605 = vmatmul.msk.f32.vlgmr.msrb.gmra.mxu3 %vm56_vm0, %v751_v4  ;;  %v271_v4 = vpop.f32.mrf.mxu1 }
 0x2d8   :  { %535 = vmatpush.msra.mxu3 %v515_v36 }
 0x2da   :  { %536 = vmatpush.msra.mxu3 %v514_v40 }
 0x2dc   :  { %537 = vmatpush.msra.mxu3 %v513_v41 }
 0x2de   :  { %538 = vmatpush.msra.mxu3 %v512_v42 }
 0x2df   :  { %606 = vmatmul.msk.f32.gmra.mxu3 %vm56_vm0, %v758_v5  ;;  %v294_v5 = vpop.f32.mrf.mxu2 }
 0x2e0   :  { %v295_v13 = vadd.f32 %v294_v5, %v265_v1 }
 0x2e7   :  { %607 = vmatmul.msk.f32.gmra.mxu3 %vm56_vm0, %v765_v6  ;;  %v274_v6 = vpop.f32.mrf.mxu1  ;;  %v297_v8 = vpop.f32.mrf.mxu2 }
 0x2e8   :  { %v298_v9 = vadd.f32 %v297_v8, %v268_v2 }
 0x2ef   :  { %608 = vmatmul.msk.f32.gmra.mxu3 %vm56_vm0, %v772_v7  ;;  %v300_v12 = vpop.f32.mrf.mxu2 }
 0x2f0   :  { %v301_v20 = vadd.f32 %v300_v12, %v271_v4 }
 0x2f7   :  { %v303_v16 = vpop.f32.mrf.mxu2 }
 0x2f8   :  { %v304_v17 = vadd.f32 %v303_v16, %v274_v6 }
 0x35a   :  { %v359_v53 = vpop.f32.mrf.mxu3 }
 0x35b   :  { %v360_v54 = vadd.f32 %v625_v52, %v359_v53 }
 0x35d   :  { %v371_v55 = vmax.f32 %v360_v54, 0.0 }
 0x35f   :  { %610 = vmatmul.msk.f32.vlgmr.msra.gmra.mxu1 %vm155_vm3, %v371_v55 }
 0x362   :  { %v362_v56 = vpop.f32.mrf.mxu3 }
 0x363   :  { %v363_v57 = vadd.f32 %v625_v52, %v362_v56 }
 0x365   :  { %v372_v58 = vmax.f32 %v363_v57, 0.0 }
 0x367   :  { %611 = vmatmul.msk.f32.gmra.mxu1 %vm155_vm3, %v372_v58 }
 0x36a   :  { %v365_v59 = vpop.f32.mrf.mxu3 }
 0x36b   :  { %v366_v60 = vadd.f32 %v625_v52, %v365_v59 }
 0x36d   :  { %v373_v61 = vmax.f32 %v366_v60, 0.0 }
 0x36f   :  { %612 = vmatmul.msk.f32.gmra.mxu1 %vm155_vm3, %v373_v61 }
 0x372   :  { %v368_v62 = vpop.f32.mrf.mxu3 }
 0x373   :  { %v369_v63 = vadd.f32 %v625_v52, %v368_v62 }
 0x375   :  { %v374_v0 = vmax.f32 %v369_v63, 0.0 }
 0x377   :  { %613 = vmatmul.msk.f32.gmra.mxu1 %vm155_vm3, %v374_v0 }
 0x3dc   :  { %v406_v7 = vpop.f32.mrf.mxu1 }
 0x3dd   :  { %v418_v15 = vadd.f32 %v406_v7, %v295_v13 }
 0x3e4   :  { %v409_v10 = vpop.f32.mrf.mxu1 }
 0x3e5   :  { %v419_v11 = vadd.f32 %v409_v10, %v298_v9 }
 0x3e7   :  { %433 = vperm.xlu1 %622, %v419_v11  }
 0x3ec   :  { %v412_v14 = vpop.f32.mrf.mxu1 }
 0x3ed   :  { %v420_v21 = vadd.f32 %v412_v14, %v301_v20 }
 0x3ef   :  { %428 = vperm.xlu1 %622, %v418_v15  }
 0x3f4   :  { %v415_v18 = vpop.f32.mrf.mxu1 }
 0x3f5   :  { %v421_v19 = vadd.f32 %v415_v18, %v304_v17 }
 0x3f7   :  { %443 = vperm.xlu0 %621, %v421_v19  }
 0x3ff   :  { %438 = vperm.xlu0 %621, %v420_v21  }
 0x459   :  { %v434_v24 = vpop.permute.xlu1 %433 }
 0x45a   :  { %v447_v33 = vmul.f32 %v434_v24, %v423_v28 }
 0x461   :  { %v429_v32 = vpop.permute.xlu1 %428 }
 0x462   :  { %v446_v34 = vmul.f32 %v429_v32, %v422_v31 }
 0x469   :  { %v444_v25 = vpop.permute.xlu0 %443 }
 0x46a   :  { %v449_v26 = vmul.f32 %v444_v25, %v425_v23 }
 0x46c   :  { %470 = vmatpush.msrb.mxu2 %v449_v26 }
 0x471   :  { %v439_v29 = vpop.permute.xlu0 %438 }
 0x472   :  { %v448_v30 = vmul.f32 %v439_v29, %v424_v27 }
 0x474   :  { %471 = vmatpush.msrb.mxu2 %v448_v30 }
 0x476   :  { %472 = vmatpush.msrb.mxu2 %v447_v33 }
 0x478   :  { %473 = vmatpush.msrb.mxu2 %v446_v34 }
 0x479   :  { %614 = vmatmul.msk.f32.vlgmr.msrb.gmra.mxu2 %vm56_vm0, %v450_v35 }
 0x4fc   :  { %v475_v38 = vpop.f32.mrf.mxu2 }
 0x4fd   :  { %v476_v39 = vadd.f32 %v626_v37, %v475_v38 }
 0x4ff   :  { %616 = vmatmul.msk.f32.vlgmr.msra.gmra.mxu0 %vm483_vm5, %v476_v39 }
 0x57c   :  { %v508_v44 = vpop.f32.mrf.mxu0 }
 0x57d   :  { %v509_v45 = vadd.f32 %v627_v43, %v508_v44 }
 0x57f   :  { %v511_v46 = vmax.f32 %v509_v45, 0.0 }
 0x581   :  { %617 = vmatmul.msk.f32.vlgmr.msra.gmra.mxu3 %vm56_vm0, %v511_v46 }
 0x604   :  { %v540_v48 = vpop.f32.mrf.mxu3 }
 0x605   :  { %v541_v49 = vadd.f32 %v628_v47, %v540_v48 }
 0x607   :  { %v544_v50 = vsel %vm543_vm6, %v541_v49, -inf }
 0x608   :  { %545 = vmax.xlane.f32.xlu2 %v544_v50 }
 0x67b   :  { %v546_v51 = vpop.xlane.xlu2 %545 }
 0x67c   :  { %v547_v52 = vsub.f32 %v541_v49, %v546_v51 }
 0x67e   :  { %v548_v53 = vmul.f32 1.442695, %v547_v52 }
 0x680   :  { %629 = vpow2.f32 %v548_v53 }
 0x686   :  { %v630_v54 = vpop.eup %629 }
 0x687   :  { %v550_v55 = vsel %vm543_vm6, %v630_v54, 0.0 }
 0x688   :  { %551 = vadd.xlane.f32.xlu2 %v550_v55 }
 0x6fb   :  { %v552_v56 = vpop.xlane.xlu2 %551 }
 0x6fc   :  { %631 = vlog2.f32 %v552_v56 }
 0x702   :  { %v632_v57 = vpop.eup %631 }
 0x703   :  { %v554_v58 = vmul.f32 0.6931472, %v632_v57 }
 0x705   :  { %v555_v59 = vsub.f32 %v547_v52, %v554_v58 }
 0x707   :  { %556 = vst.msk [vmem:[#allocation2] sm:$0x3] %vm543_vm6, %v555_v59 }
 0x708   :  { %567 = dma.vmem_to_hbm [thread:$0]  %s563_s12, 32, %s565_s5, [#allocation3]  }
 0x709   :  { %657 = dma.done.wait [#allocation3], 32  }
 0x70a   :  { %658 = vsyncadd [#allocation3], 4294967264 }
 0x70b   :  { %572 = vsyncpa [#allocation3], 1 }

</bundles_post_ra>
